<compile_context>
chip_gen: v7x
topology: tpu7x:2x2x1
jax: 0.10.0
libtpu: 0.0.40
codegen_flags: <defaults>
</compile_context>

<pallas_src>
import functools
import math

import jax
import jax.numpy as jnp
from jax.experimental import pallas as pl
from jax.experimental.pallas import tpu as pltpu


# ----------------------------------------------------------------------------
# In-kernel row softmax: exp/reduce in f32, EUP reciprocal + one Newton step.
# ----------------------------------------------------------------------------
def _softmax_rows(z):
    z = z - jnp.max(z, axis=-1, keepdims=True)
    e = jnp.exp(z)
    s = jnp.sum(e, axis=-1, keepdims=True)
    r = pl.reciprocal(s, approx=True)     # EUP vrcp (own VLIW slot)
    r = r * (2.0 - s * r)                 # one Newton step -> ~f32-exact
    return e * r


# ----------------------------------------------------------------------------
# Fused kernel: QKV projection + .view-as-permutation attention + fc + softmax
# ----------------------------------------------------------------------------
def fused_attention_head_kernel(x_ref, wqkv_ref, bqkv_ref, wfc_ref, bfc_ref,
                                o_ref, *, batch, seq_len):
    x = x_ref[...]                                                   # (B*S, D)
    S = seq_len

    # One MXU matmul for all three projections.
    # Q columns already carry 1/sqrt(d_model) and the .view permutation.
    qkv = (jnp.dot(x, wqkv_ref[...], preferred_element_type=jnp.float32)
           + bqkv_ref[...])                                          # (B*S, 3*dk)
    dk = qkv.shape[-1] // 3
    m = dk // S

    q = qkv[:, :dk]
    k = qkv[:, dk:2 * dk]
    v = qkv[:, 2 * dk:]

    # Per-batch scores; torch's k.view(B, -1, S) becomes m accumulated
    # contiguous-slice matmuls thanks to the permutation folded into Wq/bq.
    score_blocks = []
    for b in range(batch):                                  # B=2, unrolled
        qb = q[b * S:(b + 1) * S, :]                        # (S, dk)
        kb = k[b * S:(b + 1) * S, :]                        # (S, dk)
        sb = jnp.dot(qb[:, :S], kb[:, :S],
                     preferred_element_type=jnp.float32)    # (S, S)
        for j in range(1, m):
            sb = sb + jnp.dot(qb[:, j * S:(j + 1) * S],
                              kb[:, j * S:(j + 1) * S],
                              preferred_element_type=jnp.float32)
        score_blocks.append(sb)
    scores = jnp.concatenate(score_blocks, axis=0)          # (B*S, S)

    attn = _softmax_rows(scores)                            # (B*S, S)

    ctx_blocks = []
    for b in range(batch):
        ctx_blocks.append(
            jnp.dot(attn[b * S:(b + 1) * S, :], v[b * S:(b + 1) * S, :],
                    preferred_element_type=jnp.float32))    # (S, dk)
    ctx = jnp.concatenate(ctx_blocks, axis=0)               # (B*S, dk)

    out = (jnp.dot(ctx, wfc_ref[...], preferred_element_type=jnp.float32)
           + bfc_ref[...])                                  # (B*S, D)
    o_ref[...] = _softmax_rows(out).astype(o_ref.dtype)


# ----------------------------------------------------------------------------
# One-time parameter packing: concat Q|K|V, fold score scale + view permutation.
# ----------------------------------------------------------------------------
def prepare_params(params, d_model, seq_len):
    dk = params["wq"].shape[1]
    scale = 1.0 / math.sqrt(d_model)
    if dk % seq_len != 0:
        # TODO(synk): general row-major .view(B, -1, S) with dk % S != 0 needs a
        # different decomposition; only dk % seq_len == 0 is supported here.
        raise NotImplementedError("dk must be a multiple of seq_len")
    m = dk // seq_len
    # P[r*m + j, j*S + r] = 1  =>  (q @ P)[:, j*S + r] = q[:, r*m + j], which lets
    # the kernel realize torch's k.view(B, -1, S) with contiguous-slice matmuls.
    d_idx = jnp.arange(dk)
    col = (d_idx % m) * seq_len + d_idx // m
    perm = jnp.zeros((dk, dk), jnp.float32).at[d_idx, col].set(1.0)

    wq_f = (params["wq"] * scale) @ perm
    bq_f = (params["bq"] * scale) @ perm
    wqkv = jnp.concatenate([wq_f, params["wk"], params["wv"]], axis=1)  # (D, 3*dk)
    bqkv = jnp.concatenate([bq_f, params["bk"], params["bv"]], axis=1)  # (1, 3*dk)
    return dict(wqkv=wqkv, bqkv=bqkv, wfc=params["wfc"], bfc=params["bfc"])


# ----------------------------------------------------------------------------
# Wrapper: single pallas_call, whole arrays resident in VMEM, no grid.
# ----------------------------------------------------------------------------
@jax.jit
def attention_head_forward(x, packed):
    B, S, D = x.shape
    xf = x.reshape(B * S, D)   # free row-major flatten; feeds one wide MXU matmul
    kernel = functools.partial(fused_attention_head_kernel, batch=B, seq_len=S)
    vmem = pl.BlockSpec(memory_space=pltpu.MemorySpace.VMEM)
    out = pl.pallas_call(
        kernel,
        out_shape=jax.ShapeDtypeStruct((B * S, D), jnp.float32),
        in_specs=[vmem] * 5,
        out_specs=vmem,
    )(xf, packed["wqkv"], packed["bqkv"], packed["wfc"], packed["bfc"])
    return out.reshape(B, S, D)


# ----------------------------------------------------------------------------
# Pure-JAX reference (mirrors the PyTorch forward exactly, unpacked params)
# ----------------------------------------------------------------------------
def reference_forward(x, params):
    B, S, D = x.shape
    dk = params["wq"].shape[1]
    q = x @ params["wq"] + params["bq"][0]
    k = (x @ params["wk"] + params["bk"][0]).reshape(B, dk, S)   # torch .view
    v = x @ params["wv"] + params["bv"][0]
    scores = jnp.einsum("bsd,bdt->bst", q, k) / math.sqrt(D)
    attn = jax.nn.softmax(scores, axis=-1)
    ctx = jnp.einsum("bst,btd->bsd", attn, v)
    return jax.nn.softmax(ctx @ params["wfc"] + params["bfc"][0], axis=-1)


def init_params(key, d_model, dk):
    """PyTorch-style uniform init. Weights stored transposed (in, out);
    biases stored as (1, out)."""
    ks = jax.random.split(key, 8)
    def lin(kw, kb, fan_in, fan_out):
        bound = 1.0 / math.sqrt(fan_in)
        w = jax.random.uniform(kw, (fan_in, fan_out), jnp.float32, -bound, bound)
        b = jax.random.uniform(kb, (1, fan_out), jnp.float32, -bound, bound)
        return w, b
    wq, bq = lin(ks[0], ks[1], d_model, dk)
    wk, bk = lin(ks[2], ks[3], d_model, dk)
    wv, bv = lin(ks[4], ks[5], d_model, dk)
    wfc, bfc = lin(ks[6], ks[7], dk, d_model)
    return dict(wq=wq, bq=bq, wk=wk, bk=bk, wv=wv, bv=bv, wfc=wfc, bfc=bfc)


if __name__ == "__main__":
    B, S, d_model, dk = 2, 8, 32, 16

    key = jax.random.PRNGKey(0)
    kx, kp = jax.random.split(key)
    x = jax.random.normal(kx, (B, S, d_model), dtype=jnp.float32)
    params = init_params(kp, d_model, dk)
    packed = prepare_params(params, d_model, S)   # one-time packing (not per call)

    out = attention_head_forward(x, packed)
    out = jax.block_until_ready(out)

    ref = reference_forward(x, params)
    assert out.shape == (B, S, d_model)
    assert jnp.allclose(out, ref, atol=1e-5, rtol=1e-5), "mismatch vs reference"

    print("KERNEL_OK")
</pallas_src>

<mosaic_0001>
module attributes {stable_mosaic.version = 11 : i64} {
  func.func @fused_attention_head_kernel(%arg0: memref<16x32xf32, #tpu.memory_space<vmem>>, %arg1: memref<32x48xf32, #tpu.memory_space<vmem>>, %arg2: memref<1x48xf32, #tpu.memory_space<vmem>>, %arg3: memref<16x32xf32, #tpu.memory_space<vmem>>, %arg4: memref<1x32xf32, #tpu.memory_space<vmem>>, %arg5: memref<16x32xf32, #tpu.memory_space<vmem>>) attributes {dimension_semantics = [], scalar_prefetch = 0 : i64, scratch_operands = 0 : i64, tpu.core_type = #tpu.core_type<tc>} {
    %c0 = arith.constant 0 : index
    %c0_0 = arith.constant 0 : index
    %0 = vector.load %arg0[%c0, %c0_0] : memref<16x32xf32, #tpu.memory_space<vmem>>, vector<16x32xf32>
    %c0_1 = arith.constant 0 : index
    %c0_2 = arith.constant 0 : index
    %1 = vector.load %arg1[%c0_1, %c0_2] : memref<32x48xf32, #tpu.memory_space<vmem>>, vector<32x48xf32>
    %cst = arith.constant dense<0.000000e+00> : vector<16x48xf32>
    %2 = tpu.matmul %0, %1, %cst {dimension_numbers = #tpu.dot_dimension_numbers<[1], [0], [0], [1], [0, 0, 1, 1], [], []>} : vector<16x32xf32>, vector<32x48xf32>, vector<16x48xf32> -> vector<16x48xf32>
    %c0_3 = arith.constant 0 : index
    %c0_4 = arith.constant 0 : index
    %3 = vector.load %arg2[%c0_3, %c0_4] : memref<1x48xf32, #tpu.memory_space<vmem>>, vector<1x48xf32>
    %4 = vector.broadcast %3 : vector<1x48xf32> to vector<16x48xf32>
    %5 = arith.addf %2, %4 : vector<16x48xf32>
    %6 = vector.extract_strided_slice %5 {offsets = [0, 0], sizes = [16, 16], strides = [1, 1]} : vector<16x48xf32> to vector<16x16xf32>
    %7 = vector.extract_strided_slice %5 {offsets = [0, 16], sizes = [16, 16], strides = [1, 1]} : vector<16x48xf32> to vector<16x16xf32>
    %8 = vector.extract_strided_slice %5 {offsets = [0, 32], sizes = [16, 16], strides = [1, 1]} : vector<16x48xf32> to vector<16x16xf32>
    %9 = vector.extract_strided_slice %6 {offsets = [0, 0], sizes = [8, 16], strides = [1, 1]} : vector<16x16xf32> to vector<8x16xf32>
    %10 = vector.extract_strided_slice %7 {offsets = [0, 0], sizes = [8, 16], strides = [1, 1]} : vector<16x16xf32> to vector<8x16xf32>
    %11 = vector.extract_strided_slice %9 {offsets = [0, 0], sizes = [8, 8], strides = [1, 1]} : vector<8x16xf32> to vector<8x8xf32>
    %12 = vector.extract_strided_slice %10 {offsets = [0, 0], sizes = [8, 8], strides = [1, 1]} : vector<8x16xf32> to vector<8x8xf32>
    %cst_5 = arith.constant dense<0.000000e+00> : vector<8x8xf32>
    %13 = tpu.matmul %11, %12, %cst_5 {dimension_numbers = #tpu.dot_dimension_numbers<[1], [0], [0], [1], [0, 0, 1, 1], [], []>} : vector<8x8xf32>, vector<8x8xf32>, vector<8x8xf32> -> vector<8x8xf32>
    %14 = vector.extract_strided_slice %9 {offsets = [0, 8], sizes = [8, 8], strides = [1, 1]} : vector<8x16xf32> to vector<8x8xf32>
    %15 = vector.extract_strided_slice %10 {offsets = [0, 8], sizes = [8, 8], strides = [1, 1]} : vector<8x16xf32> to vector<8x8xf32>
    %cst_6 = arith.constant dense<0.000000e+00> : vector<8x8xf32>
    %16 = tpu.matmul %14, %15, %cst_6 {dimension_numbers = #tpu.dot_dimension_numbers<[1], [0], [0], [1], [0, 0, 1, 1], [], []>} : vector<8x8xf32>, vector<8x8xf32>, vector<8x8xf32> -> vector<8x8xf32>
    %17 = arith.addf %13, %16 : vector<8x8xf32>
    %18 = vector.extract_strided_slice %6 {offsets = [8, 0], sizes = [8, 16], strides = [1, 1]} : vector<16x16xf32> to vector<8x16xf32>
    %19 = vector.extract_strided_slice %7 {offsets = [8, 0], sizes = [8, 16], strides = [1, 1]} : vector<16x16xf32> to vector<8x16xf32>
    %20 = vector.extract_strided_slice %18 {offsets = [0, 0], sizes = [8, 8], strides = [1, 1]} : vector<8x16xf32> to vector<8x8xf32>
    %21 = vector.extract_strided_slice %19 {offsets = [0, 0], sizes = [8, 8], strides = [1, 1]} : vector<8x16xf32> to vector<8x8xf32>
    %cst_7 = arith.constant dense<0.000000e+00> : vector<8x8xf32>
    %22 = tpu.matmul %20, %21, %cst_7 {dimension_numbers = #tpu.dot_dimension_numbers<[1], [0], [0], [1], [0, 0, 1, 1], [], []>} : vector<8x8xf32>, vector<8x8xf32>, vector<8x8xf32> -> vector<8x8xf32>
    %23 = vector.extract_strided_slice %18 {offsets = [0, 8], sizes = [8, 8], strides = [1, 1]} : vector<8x16xf32> to vector<8x8xf32>
    %24 = vector.extract_strided_slice %19 {offsets = [0, 8], sizes = [8, 8], strides = [1, 1]} : vector<8x16xf32> to vector<8x8xf32>
    %cst_8 = arith.constant dense<0.000000e+00> : vector<8x8xf32>
    %25 = tpu.matmul %23, %24, %cst_8 {dimension_numbers = #tpu.dot_dimension_numbers<[1], [0], [0], [1], [0, 0, 1, 1], [], []>} : vector<8x8xf32>, vector<8x8xf32>, vector<8x8xf32> -> vector<8x8xf32>
    %26 = arith.addf %22, %25 : vector<8x8xf32>
    %27 = tpu.concatenate %17, %26 in 0 : vector<8x8xf32>, vector<8x8xf32> -> vector<16x8xf32>
    %cst_9 = arith.constant dense<0xFF800000> : vector<16xf32>
    %28 = vector.multi_reduction <maximumf>, %27, %cst_9 [1] : vector<16x8xf32> to vector<16xf32>
    %29 = vector.shape_cast %28 : vector<16xf32> to vector<16x1xf32>
    %30 = vector.broadcast %29 : vector<16x1xf32> to vector<16x8xf32>
    %31 = arith.subf %27, %30 : vector<16x8xf32>
    %32 = math.exp %31 : vector<16x8xf32>
    %cst_10 = arith.constant dense<0.000000e+00> : vector<16xf32>
    %33 = vector.multi_reduction <add>, %32, %cst_10 [1] : vector<16x8xf32> to vector<16xf32>
    %34 = vector.shape_cast %33 : vector<16xf32> to vector<16x1xf32>
    %35 = tpu.reciprocal %34 {approx = true} : vector<16x1xf32> -> vector<16x1xf32>
    %36 = arith.mulf %34, %35 : vector<16x1xf32>
    %cst_11 = arith.constant 2.000000e+00 : f32
    %37 = vector.broadcast %cst_11 : f32 to vector<16x1xf32>
    %38 = arith.subf %37, %36 : vector<16x1xf32>
    %39 = arith.mulf %35, %38 : vector<16x1xf32>
    %40 = vector.broadcast %39 : vector<16x1xf32> to vector<16x8xf32>
    %41 = arith.mulf %32, %40 : vector<16x8xf32>
    %42 = vector.extract_strided_slice %41 {offsets = [0, 0], sizes = [8, 8], strides = [1, 1]} : vector<16x8xf32> to vector<8x8xf32>
    %43 = vector.extract_strided_slice %8 {offsets = [0, 0], sizes = [8, 16], strides = [1, 1]} : vector<16x16xf32> to vector<8x16xf32>
    %cst_12 = arith.constant dense<0.000000e+00> : vector<8x16xf32>
    %44 = tpu.matmul %42, %43, %cst_12 {dimension_numbers = #tpu.dot_dimension_numbers<[1], [0], [0], [1], [0, 0, 1, 1], [], []>} : vector<8x8xf32>, vector<8x16xf32>, vector<8x16xf32> -> vector<8x16xf32>
    %45 = vector.extract_strided_slice %41 {offsets = [8, 0], sizes = [8, 8], strides = [1, 1]} : vector<16x8xf32> to vector<8x8xf32>
    %46 = vector.extract_strided_slice %8 {offsets = [8, 0], sizes = [8, 16], strides = [1, 1]} : vector<16x16xf32> to vector<8x16xf32>
    %cst_13 = arith.constant dense<0.000000e+00> : vector<8x16xf32>
    %47 = tpu.matmul %45, %46, %cst_13 {dimension_numbers = #tpu.dot_dimension_numbers<[1], [0], [0], [1], [0, 0, 1, 1], [], []>} : vector<8x8xf32>, vector<8x16xf32>, vector<8x16xf32> -> vector<8x16xf32>
    %48 = tpu.concatenate %44, %47 in 0 : vector<8x16xf32>, vector<8x16xf32> -> vector<16x16xf32>
    %c0_14 = arith.constant 0 : index
    %c0_15 = arith.constant 0 : index
    %49 = vector.load %arg3[%c0_14, %c0_15] : memref<16x32xf32, #tpu.memory_space<vmem>>, vector<16x32xf32>
    %cst_16 = arith.constant dense<0.000000e+00> : vector<16x32xf32>
    %50 = tpu.matmul %48, %49, %cst_16 {dimension_numbers = #tpu.dot_dimension_numbers<[1], [0], [0], [1], [0, 0, 1, 1], [], []>} : vector<16x16xf32>, vector<16x32xf32>, vector<16x32xf32> -> vector<16x32xf32>
    %c0_17 = arith.constant 0 : index
    %c0_18 = arith.constant 0 : index
    %51 = vector.load %arg4[%c0_17, %c0_18] : memref<1x32xf32, #tpu.memory_space<vmem>>, vector<1x32xf32>
    %52 = vector.broadcast %51 : vector<1x32xf32> to vector<16x32xf32>
    %53 = arith.addf %50, %52 : vector<16x32xf32>
    %cst_19 = arith.constant dense<0xFF800000> : vector<16xf32>
    %54 = vector.multi_reduction <maximumf>, %53, %cst_19 [1] : vector<16x32xf32> to vector<16xf32>
    %55 = vector.shape_cast %54 : vector<16xf32> to vector<16x1xf32>
    %56 = vector.broadcast %55 : vector<16x1xf32> to vector<16x32xf32>
    %57 = arith.subf %53, %56 : vector<16x32xf32>
    %58 = math.exp %57 : vector<16x32xf32>
    %cst_20 = arith.constant dense<0.000000e+00> : vector<16xf32>
    %59 = vector.multi_reduction <add>, %58, %cst_20 [1] : vector<16x32xf32> to vector<16xf32>
    %60 = vector.shape_cast %59 : vector<16xf32> to vector<16x1xf32>
    %61 = tpu.reciprocal %60 {approx = true} : vector<16x1xf32> -> vector<16x1xf32>
    %62 = arith.mulf %60, %61 : vector<16x1xf32>
    %cst_21 = arith.constant 2.000000e+00 : f32
    %63 = vector.broadcast %cst_21 : f32 to vector<16x1xf32>
    %64 = arith.subf %63, %62 : vector<16x1xf32>
    %65 = arith.mulf %61, %64 : vector<16x1xf32>
    %66 = vector.broadcast %65 : vector<16x1xf32> to vector<16x32xf32>
    %67 = arith.mulf %58, %66 : vector<16x32xf32>
    %c0_22 = arith.constant 0 : index
    %c0_23 = arith.constant 0 : index
    %68 = vector.load %arg5[%c0_22, %c0_23] : memref<16x32xf32, #tpu.memory_space<vmem>>, vector<16x32xf32>
    tpu.vector_store %arg5[%c0_22, %c0_23], %67 {strides = array<i32>} : memref<16x32xf32, #tpu.memory_space<vmem>>, vector<16x32xf32>,
    return
  }
}

</mosaic_0001>

<bundles_post_ra>
// kernel: attention_head_forward.1
= control target key start
LH: loop header
LB: loop body
LE: loop exit
PB: predicated region body
PF: predicated region fallthrough
CT: control target
= control target key end

     0   :  { %10 = vsyncpa [#allocation3], 0  ;;  %s1154_s0 = inlined_call_operand.hbm [shape: f32[16,32], index: 0, kind: input, shape index: {}]   ;;  %s1155_s1 = inlined_call_operand.hbm [shape: f32[32,48], index: 1, kind: input, shape index: {}]   ;;  %s1156_s2 = inlined_call_operand.vmem [shape: f32[1,48], index: 2, kind: input, shape index: {}]   ;;  %s1157_s3 = inlined_call_operand.hbm [shape: f32[16,32], index: 3, kind: input, shape index: {}]   ;;  %s1158_s4 = inlined_call_operand.vmem [shape: f32[1,32], index: 4, kind: input, shape index: {}]   ;;  %s1159_s5 = inlined_call_operand.hbm [shape: f32[16,32], index: 5, kind: output, shape index: {}]  }
   0x1   :  { %11 = vsyncpa [#allocation6], 0 }
   0x2   :  { %12 = vsyncpa [#allocation4], 0  ;;  %s1003_s18 = smov [#allocation5]   ;;  %s1004_s20 = smov [#allocation2]  }
   0x3   :  { %s30_s19 = sshll.u32 %s1003_s18, 4  ;;  %s18_s21 = sshll.u32 %s1004_s20, 4  ;;  %s31_s19 = int_to_ptr.vmem [resolvable:$true] %s30_s19  ;;  %s1045_s21 = int_to_ptr.vmem [resolvable:$true] %s18_s21 }
   0x4   :  { %s909_s24 = scalar_lea.hbm %s1155_s1, 512 }
   0x5   :  { %p910_p0 = scmp.ne.s32.totalorder %s1155_s1, %s909_s24  ;;  %p913_p1 = scmp.lt.u32.totalorder %s909_s24, %s1155_s1 }
   0x7   :  { %p915_p2 = pnand %p913_p1, %p910_p0 }
   0x9   :  { %918 = shalt.err (!%p915_p2)
}
   0xa   :  { %s919_s29 = scalar_lea.vmem %s31_s19, 512  ;;  %p924_p4 = scmp.lt.s32.totalorder %s31_s19, %s31_s19 }
   0xb   :  { %p920_p3 = scmp.ne.s32.totalorder %s31_s19, %s919_s29  ;;  %p925_p5 = scmp.lt.s32.totalorder %s919_s29, %s919_s29 }
   0xd   :  { %p926_p6 = por %p925_p5, %p924_p4 }
   0xf   :  { %p927_p7 = pnand %p926_p6, %p920_p3 }
  0x11   :  { %930 = shalt.err (!%p927_p7)
}
  0x12   :  { %s1005_s30 = smov 128   ;;  %s1006_s6 = smov 8  }
  0x13   :  { %36 = dma.hbm_to_vmem [thread:$0]  %s1155_s1, 512, %s31_s19, [#allocation6], %s1005_s30, %s1005_s30, %s1006_s6  }
  0x14   :  { %s931_s11 = scalar_lea.hbm %s1154_s0, 256 }
  0x15   :  { %p932_p8 = scmp.ne.s32.totalorder %s1154_s0, %s931_s11  ;;  %p935_p9 = scmp.lt.u32.totalorder %s931_s11, %s1154_s0 }
  0x17   :  { %p937_p10 = pnand %p935_p9, %p932_p8 }
  0x19   :  { %940 = shalt.err (!%p937_p10)
}
  0x1a   :  { %s941_s16 = scalar_lea.vmem %s1045_s21, 256  ;;  %p946_p12 = scmp.lt.s32.totalorder %s1045_s21, %s1045_s21 }
  0x1b   :  { %p942_p11 = scmp.ne.s32.totalorder %s1045_s21, %s941_s16  ;;  %p947_p13 = scmp.lt.s32.totalorder %s941_s16, %s941_s16 }
  0x1d   :  { %p948_p0 = por %p947_p13, %p946_p12 }
  0x1f   :  { %p949_p1 = pnand %p948_p0, %p942_p11 }
  0x21   :  { %952 = shalt.err (!%p949_p1)
}
  0x22   :  { %24 = dma.hbm_to_vmem [thread:$0]  %s1154_s0, 256, %s1045_s21, [#allocation3], %s1005_s30, %s1005_s30, %s1006_s6  }
  0x23   :  { %s1007_s18 = smov [#allocation7]   ;;  %s953_s23 = scalar_lea.hbm %s1157_s3, 256 }
  0x24   :  { %s44_s19 = sshll.u32 %s1007_s18, 4  ;;  %p954_p2 = scmp.ne.s32.totalorder %s1157_s3, %s953_s23  ;;  %s45_s19 = int_to_ptr.vmem [resolvable:$true] %s44_s19 }
  0x25   :  { %p957_p3 = scmp.lt.u32.totalorder %s953_s23, %s1157_s3 }
  0x27   :  { %p959_p4 = pnand %p957_p3, %p954_p2 }
  0x29   :  { %962 = shalt.err (!%p959_p4)
}
  0x2a   :  { %s963_s28 = scalar_lea.vmem %s45_s19, 256  ;;  %p968_p6 = scmp.lt.s32.totalorder %s45_s19, %s45_s19 }
  0x2b   :  { %p964_p5 = scmp.ne.s32.totalorder %s45_s19, %s963_s28  ;;  %p969_p7 = scmp.lt.s32.totalorder %s963_s28, %s963_s28 }
  0x2d   :  { %p970_p8 = por %p969_p7, %p968_p6 }
  0x2f   :  { %p971_p9 = pnand %p970_p8, %p964_p5 }
  0x31   :  { %974 = shalt.err (!%p971_p9)
}
  0x32   :  { %50 = dma.hbm_to_vmem [thread:$0]  %s1157_s3, 256, %s45_s19, [#allocation6], %s1005_s30, %s1005_s30, %s1006_s6  }
  0x33   :  { %997 = dma.done.wait [#allocation3], 256  }
  0x34   :  { %998 = vsyncadd [#allocation3], 4294967040 }
  0x35   :  { %999 = dma.done.wait [#allocation6], 768  }
  0x36   :  { %1000 = vsyncadd [#allocation6], 4294966528  ;;  %vm75_vm0 = vcmask 261120   ;;  %v64_v0 = vld [vmem:[#allocation5] sm:$0xff]  ;;  %v65_v1 = vld [vmem:[#allocation5 + $0x8] sm:$0xff]  ;;  %v1008_v8 = vmov 0.0  }
  0x37   :  { %v66_v2 = vld [vmem:[#allocation5 + $0x10] sm:$0xff]  ;;  %v865_v3 = vpack.c.bf16 %v65_v1, %v64_v0  ;;  %v67_v4 = vld [vmem:[#allocation5 + $0x18] sm:$0xff]  ;;  %828 = vmatprep.subr.mxu1 %v1008_v8  ;;  %vm1009_vm1 = vmmov 0   ;;  %s1010_s7 = smov 112   ;;  %s1011_s8 = smov 104   ;;  %vm163_vm2 = vcmask 64512  }
  0x38   :  { %v62_v5 = vld [vmem:[#allocation2] sm:$0xff]  ;;  %v869_v6 = vpack.c.bf16 %v67_v4, %v66_v2  ;;  %v63_v7 = vld [vmem:[#allocation2 + $0x8] sm:$0xff]  ;;  %830 = vmatprep.mubr.msk.f32.mxu1 %vm1009_vm1, %v1008_v8  ;;  %s1012_s9 = smov 120   ;;  %v644_v50 = vld [vmem:[#allocation7] sm:$0xff]  ;;  %vm653_vm3 = vcmask 130048  }
  0x39   :  { %825 = vmatprep.mubr.msk.f32.mxu0 %vm75_vm0, %v62_v5  ;;  %866 = vmatprep.subr.bf16.mxu0 %v865_v3  ;;  %v783_v9 = vld [vmem:[%s1156_s2] ss:$0 sm:$0xff]  ;;  %s1013_s2 = smov 96   ;;  %v645_v51 = vld [vmem:[#allocation7 + $0x8] sm:$0xff] }
  0x3a   :  { %868 = vmatpush3.bf16.msra.mxu0 %v865_v3  ;;  %v873_v52 = vpack.c.bf16 %v645_v51, %v644_v50  ;;  %v792_v57 = vld [vmem:[%s1158_s4] ss:$0 sm:$0xff]  ;;  %s1014_s4 = smov [#allocation8]  }
  0x3b   :  { %870 = vmatprep.subr.bf16.mxu0 %v869_v6  ;;  %s770_s12 = sshll.u32 %s1014_s4, 4  ;;  %s771_s12 = int_to_ptr.vmem [resolvable:$true] %s770_s12 }
  0x3c   :  { %s975_s13 = scalar_lea.vmem %s771_s12, 256  ;;  %p980_p11 = scmp.lt.s32.totalorder %s771_s12, %s771_s12 }
  0x3d   :  { %p976_p10 = scmp.ne.s32.totalorder %s771_s12, %s975_s13  ;;  %p981_p12 = scmp.lt.s32.totalorder %s975_s13, %s975_s13 }
  0x3e   :  { %872 = vmatpush3.bf16.msra.mxu0 %v869_v6 }
  0x3f   :  { %848 = vmatprep.subr.mxu0 %v1008_v8  ;;  %p982_p13 = por %p981_p12, %p980_p11 }
  0x41   :  { %826 = vmatmul.mubr.msk.f32.vlgmr.msra.gmra.mrb[0].mxu0 %vm75_vm0, %v63_v7  ;;  %p983_p0 = pnand %p982_p13, %p976_p10 }
  0x42   :  { %850 = vmatprep.mubr.msk.f32.mxu0 %vm1009_vm1, %v1008_v8 }
 0x114   :  { %v827_v10 = vpop.f32.mrb[0].mxu0 }
 0x115   :  { %v148_v11 = vpop.f32.mrb[1].mxu0  ;;  %v154_v13 = vadd.f32 %v827_v10, %v783_v9 }
 0x116   :  { %v149_v12 = vadd.f32 %v783_v9, %v148_v11 }
 0x118   :  { %236 = vrot.lane.b32.xlu1 %v149_v12, %s1010_s7  ;;  %160 = vrot.lane.b32.xlu0 %v149_v12, %s1011_s8 }
 0x11c   :  { %314 = vrot.lane.b32.xlu1 %v154_v13, %s1011_s8  ;;  %158 = vrot.lane.b32.xlu0 %v149_v12, %s1012_s9 }
 0x120   :  { %389 = vrot.lane.b32.xlu1 %v154_v13, %s1010_s7  ;;  %312 = vrot.lane.b32.xlu0 %v154_v13, %s1012_s9 }
 0x18a   :  { %v161_v14 = vpop.permute.xlu0 %160  ;;  %v237_v16 = vpop.permute.xlu1 %236 }
 0x18b   :  { %829 = vmatpush3.msra.mxu1 %v161_v14 }
 0x18c   :  { %833 = vmatprep.subr.mxu1 %v1008_v8 }
 0x18e   :  { %v159_v15 = vpop.permute.xlu0 %158  ;;  %v315_v17 = vpop.permute.xlu1 %314 }
 0x18f   :  { %831 = vmatmul.mubr.msk.f32.vlgmr.msra.gmra.mrb[0].mxu1 %vm163_vm2, %v159_v15 }
 0x190   :  { %834 = vmatpush3.msra.mxu1 %v237_v16  ;;  %835 = vmatprep.mubr.msk.f32.mxu1 %vm1009_vm1, %v1008_v8 }
 0x191   :  { %838 = vmatprep.subr.mxu1 %v1008_v8 }
 0x192   :  { %v313_v18 = vpop.permute.xlu0 %312  ;;  %v390_v19 = vpop.permute.xlu1 %389 }
 0x197   :  { %836 = vmatmul.mubr.msk.f32.vlgmr.msra.gmra.mrb[0].mxu1 %vm163_vm2, %v149_v12 }
 0x198   :  { %839 = vmatpush3.msra.mxu1 %v315_v17  ;;  %840 = vmatprep.mubr.msk.f32.mxu1 %vm1009_vm1, %v1008_v8 }
 0x199   :  { %843 = vmatprep.subr.mxu1 %v1008_v8 }
 0x19b   :  { %841 = vmatmul.mubr.msk.f32.vlgmr.msra.gmra.mrb[2].mxu1 %vm163_vm2, %v313_v18 }
 0x19c   :  { %844 = vmatpush3.msra.mxu1 %v390_v19  ;;  %845 = vmatprep.mubr.msk.f32.mxu1 %vm1009_vm1, %v1008_v8 }
 0x19d   :  { %874 = vmatprep.subr.bf16.mxu1 %v873_v52 }
 0x1a3   :  { %846 = vmatmul.mubr.msk.f32.vlgmr.msra.gmra.mrb[2].mxu1 %vm163_vm2, %v154_v13 }
 0x1a4   :  { %876 = vmatpush3.bf16.msra.mxu1 %v873_v52 }
 0x26a   :  { %v307_v20 = vpop.f32.mrb[0].mxu1 }
 0x26b   :  { %v837_v21 = vpop.f32.mrb[1].mxu1  ;;  %v464_v22 = vsel %vm163_vm2, %v307_v20, -inf }
 0x26c   :  { %465 = vmax.xlane.f32.xlu0 %v464_v22 }
 0x276   :  { %v460_v23 = vpop.f32.mrb[2].mxu1 }
 0x277   :  { %v847_v24 = vpop.f32.mrb[3].mxu1  ;;  %v467_v25 = vsel %vm163_vm2, %v460_v23, -inf }
 0x278   :  { %468 = vmax.xlane.f32.xlu1 %v467_v25 }
 0x289   :  { %492 = vrot.lane.b32.xlu1 %v149_v12, %s1013_s2 }
 0x2f9   :  { %v466_v26 = vpop.xlane.xlu0 %465 }
 0x2fa   :  { %v470_v27 = vsub.f32 %v307_v20, %v466_v26 }
 0x2fc   :  { %v472_v28 = vmul.f32 1.442695, %v470_v27 }
 0x2fe   :  { %893 = vpow2.f32 %v472_v28 }
 0x305   :  { %v469_v29 = vpop.xlane.xlu1 %468 }
 0x306   :  { %v471_v30 = vsub.f32 %v460_v23, %v469_v29 }
 0x308   :  { %v894_v31 = vpop.eup %893  ;;  %v474_v32 = vmul.f32 1.442695, %v471_v30 }
 0x309   :  { %v493_v33 = vpop.permute.xlu1 %492  ;;  %v476_v34 = vsel %vm163_vm2, %v894_v31, 0.0 }
 0x30a   :  { %895 = vpow2.f32 %v474_v32  ;;  %849 = vmatpush3.msra.mxu0 %v493_v33  ;;  %477 = vadd.xlane.f32.xlu0 %v476_v34 }
 0x30b   :  { %853 = vmatprep.subr.mxu0 %v1008_v8 }
 0x314   :  { %v896_v35 = vpop.eup %895 }
 0x315   :  { %v479_v36 = vsel %vm163_vm2, %v896_v35, 0.0 }
 0x316   :  { %480 = vadd.xlane.f32.xlu0 %v479_v36 }
 0x32c   :  { %568 = vrot.lane.b32.xlu0 %v154_v13, %s1013_s2 }
 0x397   :  { %v478_v37 = vpop.xlane.xlu0 %477 }
 0x398   :  { %897 = vrcp.f32 %v478_v37 }
 0x3a2   :  { %v898_v38 = vpop.eup %897 }
 0x3a3   :  { %v484_v39 = vmul.f32 %v898_v38, %v478_v37  ;;  %v481_v40 = vpop.xlane.xlu0 %480 }
 0x3a4   :  { %899 = vrcp.f32 %v481_v40 }
 0x3a5   :  { %v486_v41 = vsub.f32 2.0, %v484_v39 }
 0x3a7   :  { %v488_v42 = vmul.f32 %v898_v38, %v486_v41  ;;  %v569_v44 = vpop.permute.xlu0 %568 }
 0x3a9   :  { %v490_v43 = vmul.f32 %v894_v31, %v488_v42 }
 0x3ab   :  { %851 = vmatmul.mubr.msk.f32.vlgmr.msra.gmra.mrb[2].mxu0 %vm163_vm2, %v490_v43 }
 0x3ac   :  { %854 = vmatpush3.msra.mxu0 %v569_v44  ;;  %855 = vmatprep.mubr.msk.f32.mxu0 %vm1009_vm1, %v1008_v8 }
 0x3ae   :  { %v900_v45 = vpop.eup %899 }
 0x3af   :  { %v485_v46 = vmul.f32 %v900_v45, %v481_v40 }
 0x3b1   :  { %v487_v47 = vsub.f32 2.0, %v485_v46 }
 0x3b3   :  { %v489_v48 = vmul.f32 %v900_v45, %v487_v47 }
 0x3b5   :  { %v491_v49 = vmul.f32 %v896_v35, %v489_v48 }
 0x3b7   :  { %856 = vmatmul.mubr.msk.f32.vlgmr.msra.gmra.mrb[4].mxu0 %vm163_vm2, %v491_v49 }
 0x47e   :  { %v564_v53 = vpop.f32.mrb[2].mxu0 }
 0x47f   :  { %v852_v54 = vpop.f32.mrb[3].mxu0  ;;  %862 = vmatprep.mubr.msk.f32.mxu1 %vm653_vm3, %v564_v53 }
 0x48a   :  { %v640_v55 = vpop.f32.mrb[4].mxu0 }
 0x48b   :  { %v857_v56 = vpop.f32.mrb[5].mxu0  ;;  %863 = vmatmul.mubr.msk.f32.vlgmr.msra.gmra.mrb[4].mxu1 %vm653_vm3, %v640_v55 }
 0x55e   :  { %v864_v58 = vpop.f32.mrb[4].mxu1 }
 0x55f   :  { %v732_v59 = vadd.f32 %v864_v58, %v792_v57  ;;  %v726_v60 = vpop.f32.mrb[5].mxu1 }
 0x560   :  { %v727_v61 = vadd.f32 %v792_v57, %v726_v60 }
 0x561   :  { %v738_v62 = vsel %vm75_vm0, %v732_v59, -inf }
 0x562   :  { %739 = vmax.xlane.f32.xlu0 %v738_v62  ;;  %v735_v63 = vsel %vm75_vm0, %v727_v61, -inf }
 0x563   :  { %736 = vmax.xlane.f32.xlu1 %v735_v63 }
 0x5ef   :  { %v740_v0 = vpop.xlane.xlu0 %739 }
 0x5f0   :  { %v742_v1 = vsub.f32 %v732_v59, %v740_v0  ;;  %v737_v2 = vpop.xlane.xlu1 %736 }
 0x5f1   :  { %v741_v3 = vsub.f32 %v727_v61, %v737_v2 }
 0x5f2   :  { %v745_v4 = vmul.f32 1.442695, %v742_v1 }
 0x5f3   :  { %v743_v5 = vmul.f32 1.442695, %v741_v3 }
 0x5f4   :  { %901 = vpow2.f32 %v745_v4 }
 0x5f5   :  { %903 = vpow2.f32 %v743_v5 }
 0x5fe   :  { %v902_v6 = vpop.eup %901 }
 0x5ff   :  { %v904_v7 = vpop.eup %903  ;;  %v750_v8 = vsel %vm75_vm0, %v902_v6, 0.0 }
 0x600   :  { %751 = vadd.xlane.f32.xlu0 %v750_v8  ;;  %v747_v9 = vsel %vm75_vm0, %v904_v7, 0.0 }
 0x601   :  { %748 = vadd.xlane.f32.xlu1 %v747_v9 }
 0x68d   :  { %v752_v10 = vpop.xlane.xlu0 %751 }
 0x68e   :  { %905 = vrcp.f32 %v752_v10  ;;  %v749_v11 = vpop.xlane.xlu1 %748 }
 0x68f   :  { %907 = vrcp.f32 %v749_v11 }
 0x698   :  { %v906_v12 = vpop.eup %905 }
 0x699   :  { %v908_v13 = vpop.eup %907  ;;  %v756_v14 = vmul.f32 %v906_v12, %v752_v10 }
 0x69a   :  { %v755_v15 = vmul.f32 %v908_v13, %v749_v11 }
 0x69b   :  { %v758_v16 = vsub.f32 2.0, %v756_v14 }
 0x69c   :  { %v757_v17 = vsub.f32 2.0, %v755_v15 }
 0x69d   :  { %v760_v18 = vmul.f32 %v906_v12, %v758_v16 }
 0x69e   :  { %v759_v19 = vmul.f32 %v908_v13, %v757_v17 }
 0x69f   :  { %v762_v20 = vmul.f32 %v902_v6, %v760_v18 }
 0x6a0   :  { %v761_v21 = vmul.f32 %v904_v7, %v759_v19 }
 0x6a1   :  { %764 = vst.msk [vmem:[#allocation8 + $0x8] sm:$0xff] %vm75_vm0, %v762_v20 }
 0x6a2   :  { %763 = vst.msk [vmem:[#allocation8] sm:$0xff] %vm75_vm0, %v761_v21 }
 0x6a3   :  { %986 = shalt.err (!%p983_p0)
}
 0x6a4   :  { %s987_s16 = scalar_lea.hbm %s1159_s5, 256 }
 0x6a5   :  { %p988_p1 = scmp.ne.s32.totalorder %s1159_s5, %s987_s16  ;;  %p991_p2 = scmp.lt.u32.totalorder %s987_s16, %s1159_s5 }
 0x6a7   :  { %p993_p3 = pnand %p991_p2, %p988_p1 }
 0x6a9   :  { %996 = shalt.err (!%p993_p3)
}
 0x6aa   :  { %776 = dma.vmem_to_hbm [thread:$0]  %s771_s12, 256, %s1159_s5, [#allocation4], %s1005_s30, %s1005_s30, %s1006_s6  }
 0x6ab   :  { %1001 = dma.done.wait [#allocation4], 256  }
 0x6ac   :  { %1002 = vsyncadd [#allocation4], 4294967040 }
 0x6ad   :  { %780 = vsyncpa [#allocation3], 1 }
 0x6ae   :  { %781 = vsyncpa [#allocation6], 1 }
 0x6af   :  { %782 = vsyncpa [#allocation4], 1 }

</bundles_post_ra>
